<compile_context>
chip_gen: v7x
topology: tpu7x:2x2x1
jax: 0.10.0
libtpu: 0.0.40
codegen_flags: <defaults>
</compile_context>

<pallas_src>
import jax
import jax.numpy as jnp
import numpy as np
from jax.experimental import pallas as pl
from jax.experimental.pallas import tpu as pltpu

# ----- small, deterministic configuration (stand-in for 3x224x224) ---------
BATCH = 2
CH = 3
IMG_H = IMG_W = 16            # stand-in for 224
KH = KW = 4                   # conv kernel == stride (non-overlapping)
NUM_CLASSES = 8
PATCH = (8, 8)                # sticker (subimg) spatial size
LOC = (4, 4)                  # sticker top-left corner (x1, y1)
CLIP_A, CLIP_B = -1.0, 1.0    # clip_fn(x, a, b) = clamp(x, a, b)

HP, WP = IMG_H // KH, IMG_W // KW
P = HP * WP                   # number of conv output positions (H' * W')
K = CH * KH * KW              # im2col contraction dim (48)
P_TILE = 8                    # spatial positions per grid step (multiple of 8)
assert P % P_TILE == 0


# ------------------------------ layout glue ---------------------------------
def _im2col(x):
    """NCHW -> (N, H'*W', CH*KH*KW) with (CH, KH, KW) minor order."""
    n = x.shape[0]
    x = x.reshape(n, CH, HP, KH, WP, KW)
    x = x.transpose(0, 2, 4, 1, 3, 5)            # (N, H', W', CH, KH, KW)
    return x.reshape(n, P, K)


# ----------------------------- fused Pallas kernel --------------------------
def _make_fused_kernel(inv_num_pos, clip_a, clip_b):
    """compose + matmul + bias + clip + spatial-mean, accumulated over grid axis 1.

    clip_a / clip_b are baked in as compile-time constants (changing them forces
    a retrace); pass them through SMEM scalars if they must vary at runtime.
    """
    def kernel(img_ref, stk_ref, w_ref, b_ref, out_ref, acc_ref):
        t = pl.program_id(1)                     # spatial-tile (reduction) axis

        @pl.when(t == 0)
        def _init():
            acc_ref[...] = jnp.zeros_like(acc_ref)

        # compose: masked base-image patches + sticker patches (batch-broadcast)
        x = img_ref[0] + stk_ref[0]                                   # (PT, K)
        # per-position logits on the MXU
        logits = jnp.dot(x, w_ref[...], preferred_element_type=jnp.float32)
        logits = jnp.clip(logits + b_ref[...], clip_a, clip_b)        # (PT, C)
        # accumulate the spatial sum for this batch element
        acc_ref[...] += jnp.sum(logits, axis=0, keepdims=True)        # (1, C)

        @pl.when(t == pl.num_programs(1) - 1)
        def _finalize():
            out_ref[...] = (acc_ref[...] * inv_num_pos).reshape(out_ref.shape)

    return kernel


def fused_patch_attack_forward(img_patches, sticker_patches, w_flat, bias,
                               clip_a=CLIP_A, clip_b=CLIP_B):
    bsz, n_pos, kdim = img_patches.shape
    n_cls = w_flat.shape[1]
    n_tiles = n_pos // P_TILE
    kernel = _make_fused_kernel(1.0 / float(n_pos), clip_a, clip_b)
    out = pl.pallas_call(
        kernel,
        out_shape=jax.ShapeDtypeStruct((bsz, 1, n_cls), jnp.float32),
        grid_spec=pltpu.PrefetchScalarGridSpec(
            num_scalar_prefetch=0,
            grid=(bsz, n_tiles),                       # reduction axis last
            in_specs=[
                # base-image patches: one batch element, one spatial tile
                pl.BlockSpec((1, P_TILE, kdim), lambda b, t: (b, t, 0)),
                # sticker patches: batch block pinned to 0 (free broadcast)
                pl.BlockSpec((1, P_TILE, kdim), lambda b, t: (0, t, 0)),
                # weights / bias: resident, same block every step
                pl.BlockSpec((kdim, n_cls), lambda b, t: (0, 0)),
                pl.BlockSpec((1, n_cls), lambda b, t: (0, 0)),
            ],
            out_specs=pl.BlockSpec((1, 1, n_cls), lambda b, t: (b, 0, 0)),
            scratch_shapes=[pltpu.VMEM((1, n_cls), jnp.float32)],
        ),
        compiler_params=pltpu.CompilerParams(
            dimension_semantics=("parallel", "arbitrary")),
    )(img_patches, sticker_patches, w_flat, bias)
    return out[:, 0, :]


# --------------------------------- wrapper ----------------------------------
class ClippedPatchAttackWrapper:
    """JAX/Pallas port of the PyTorch ClippedPatchAttackWrapper."""

    def __init__(self, model_params, img, size, loc, clip_a=CLIP_A, clip_b=CLIP_B):
        self.w_flat, self.bias = model_params        # (K, C), (1, C)
        self.batch_size = img.shape[0]
        self.x1, self.y1 = loc
        self.x2, self.y2 = self.x1 + size[0], self.y1 + size[1]
        self.mask = jnp.ones((1, CH, IMG_H, IMG_W), jnp.float32).at[
            :, :, self.x1:self.x2, self.y1:self.y2].set(0.0)
        # PyTorch caches `self.img = mask * img` at init; additionally cache its
        # im2col form (one-time cost amortized over all SPSA forward calls).
        self.masked_img = self.mask * img
        self.img_patches = _im2col(self.masked_img)  # (B, P, K)
        self.a, self.b = clip_a, clip_b

    def _make_sticker(self, subimg):
        return jnp.zeros((1, CH, IMG_H, IMG_W), jnp.float32).at[
            :, :, self.x1:self.x2, self.y1:self.y2].set(subimg)

    def forward(self, subimg):
        # Tiny per-call layout work: (1, CH, H, W) sticker -> (1, P, K) patches.
        sticker_patches = _im2col(self._make_sticker(subimg))
        return fused_patch_attack_forward(self.img_patches, sticker_patches,
                                          self.w_flat, self.bias,
                                          self.a, self.b)


# --------------------------------- reference --------------------------------
def reference_forward(masked_img, sticker, conv_w, conv_b, a, b):
    attacked = masked_img + sticker
    logits = jax.lax.conv_general_dilated(
        attacked, conv_w, window_strides=(KH, KW), padding="VALID",
        dimension_numbers=("NCHW", "OIHW", "NHWC"))          # (B, H', W', C)
    logits = jnp.clip(logits + conv_b, a, b)                 # clip_fn
    return jnp.mean(logits, axis=(1, 2))                     # mean over (1, 2)


# ----------------------------------- main ------------------------------------
if __name__ == "__main__":
    key = jax.random.PRNGKey(0)
    k1, k2, k3, k4 = jax.random.split(key, 4)
    img = jax.random.uniform(k1, (BATCH, CH, IMG_H, IMG_W), jnp.float32)
    subimg = jax.random.uniform(k2, (1, CH, PATCH[0], PATCH[1]), jnp.float32)
    conv_w = 0.1 * jax.random.normal(k3, (NUM_CLASSES, CH, KH, KW), jnp.float32)
    conv_b = 0.1 * jax.random.normal(k4, (NUM_CLASSES,), jnp.float32)

    # flatten conv weight to the im2col matmul layout: (CH*KH*KW, NUM_CLASSES)
    w_flat = conv_w.transpose(1, 2, 3, 0).reshape(K, NUM_CLASSES)
    bias = conv_b.reshape(1, NUM_CLASSES)

    # TODO(synk): the real pretrained CNN "model" is stood in for by this single
    # non-overlapping conv; a full backbone is out of scope for one kernel.
    wrapper = ClippedPatchAttackWrapper((w_flat, bias), img, PATCH, LOC)
    out = wrapper.forward(subimg)
    out = jax.block_until_ready(out)

    ref = reference_forward(wrapper.masked_img, wrapper._make_sticker(subimg),
                            conv_w, conv_b, CLIP_A, CLIP_B)
    np.testing.assert_allclose(np.asarray(out), np.asarray(ref),
                               rtol=1e-5, atol=1e-5)
    print("KERNEL_OK")
</pallas_src>

<mosaic_0001>
module attributes {stable_mosaic.version = 11 : i64} {
  func.func @kernel(%arg0: i32, %arg1: i32, %arg2: memref<1x8x48xf32, #tpu.memory_space<vmem>>, %arg3: memref<1x8x48xf32, #tpu.memory_space<vmem>>, %arg4: memref<48x8xf32, #tpu.memory_space<vmem>>, %arg5: memref<1x8xf32, #tpu.memory_space<vmem>>, %arg6: memref<1x1x8xf32, #tpu.memory_space<vmem>>, %arg7: memref<1x8xf32, #tpu.memory_space<vmem>>) attributes {dimension_semantics = [#tpu.dimension_semantics<parallel>, #tpu.dimension_semantics<arbitrary>], iteration_bounds = array<i64: 2, 2>, scalar_prefetch = 0 : i64, scratch_operands = 1 : i64, tpu.core_type = #tpu.core_type<tc>, window_params = [{transform_indices = @transform_0, window_bounds = array<i64: 1, 8, 48>}, {transform_indices = @transform_1, window_bounds = array<i64: 1, 8, 48>}, {pipeline_mode = #tpu.pipeline_mode<synchronous>, transform_indices = @transform_2, window_bounds = array<i64: 48, 8>}, {pipeline_mode = #tpu.pipeline_mode<synchronous>, transform_indices = @transform_3, window_bounds = array<i64: 1, 8>}, {transform_indices = @transform_4, window_bounds = array<i64: 1, 1, 8>}]} {
    %c0_i32 = arith.constant 0 : i32
    %0 = arith.cmpi eq, %arg1, %c0_i32 : i32
    %1 = arith.extui %0 : i1 to i32
    %c0_i32_0 = arith.constant 0 : i32
    %2 = arith.cmpi ne, %1, %c0_i32_0 : i32
    scf.if %2 {
      %cst_18 = arith.constant 0.000000e+00 : f32
      %25 = vector.broadcast %cst_18 : f32 to vector<1x8xf32>
      %c0_19 = arith.constant 0 : index
      %c0_20 = arith.constant 0 : index
      %26 = vector.load %arg7[%c0_19, %c0_20] : memref<1x8xf32, #tpu.memory_space<vmem>>, vector<1x8xf32>
      tpu.vector_store %arg7[%c0_19, %c0_20], %25 {strides = array<i32>} : memref<1x8xf32, #tpu.memory_space<vmem>>, vector<1x8xf32>,
    } else {
    }
    %c0 = arith.constant 0 : index
    %c0_1 = arith.constant 0 : index
    %c0_2 = arith.constant 0 : index
    %3 = vector.load %arg2[%c0, %c0_1, %c0_2] : memref<1x8x48xf32, #tpu.memory_space<vmem>>, vector<1x8x48xf32>
    %4 = vector.shape_cast %3 : vector<1x8x48xf32> to vector<8x48xf32>
    %c0_3 = arith.constant 0 : index
    %c0_4 = arith.constant 0 : index
    %c0_5 = arith.constant 0 : index
    %5 = vector.load %arg3[%c0_3, %c0_4, %c0_5] : memref<1x8x48xf32, #tpu.memory_space<vmem>>, vector<1x8x48xf32>
    %6 = vector.shape_cast %5 : vector<1x8x48xf32> to vector<8x48xf32>
    %7 = arith.addf %4, %6 : vector<8x48xf32>
    %c0_6 = arith.constant 0 : index
    %c0_7 = arith.constant 0 : index
    %8 = vector.load %arg4[%c0_6, %c0_7] : memref<48x8xf32, #tpu.memory_space<vmem>>, vector<48x8xf32>
    %cst = arith.constant dense<0.000000e+00> : vector<8x8xf32>
    %9 = tpu.matmul %7, %8, %cst {dimension_numbers = #tpu.dot_dimension_numbers<[1], [0], [0], [1], [0, 0, 1, 1], [], []>} : vector<8x48xf32>, vector<48x8xf32>, vector<8x8xf32> -> vector<8x8xf32>
    %c0_8 = arith.constant 0 : index
    %c0_9 = arith.constant 0 : index
    %10 = vector.load %arg5[%c0_8, %c0_9] : memref<1x8xf32, #tpu.memory_space<vmem>>, vector<1x8xf32>
    %11 = vector.broadcast %10 : vector<1x8xf32> to vector<8x8xf32>
    %12 = arith.addf %9, %11 : vector<8x8xf32>
    %cst_10 = arith.constant -1.000000e+00 : f32
    %cst_11 = arith.constant 1.000000e+00 : f32
    %13 = vector.broadcast %cst_10 : f32 to vector<8x8xf32>
    %14 = arith.maximumf %13, %12 : vector<8x8xf32>
    %15 = vector.broadcast %cst_11 : f32 to vector<8x8xf32>
    %16 = arith.minimumf %15, %14 : vector<8x8xf32>
    %c0_12 = arith.constant 0 : index
    %c0_13 = arith.constant 0 : index
    %17 = vector.load %arg7[%c0_12, %c0_13] : memref<1x8xf32, #tpu.memory_space<vmem>>, vector<1x8xf32>
    %cst_14 = arith.constant dense<0.000000e+00> : vector<8xf32>
    %18 = vector.multi_reduction <add>, %16, %cst_14 [0] : vector<8x8xf32> to vector<8xf32>
    %19 = vector.shape_cast %18 : vector<8xf32> to vector<1x8xf32>
    %20 = arith.addf %17, %19 : vector<1x8xf32>
    %c0_15 = arith.constant 0 : index
    %c0_16 = arith.constant 0 : index
    %21 = vector.load %arg7[%c0_15, %c0_16] : memref<1x8xf32, #tpu.memory_space<vmem>>, vector<1x8xf32>
    tpu.vector_store %arg7[%c0_15, %c0_16], %20 {strides = array<i32>} : memref<1x8xf32, #tpu.memory_space<vmem>>, vector<1x8xf32>,
    %c1_i32 = arith.constant 1 : i32
    %22 = arith.cmpi eq, %arg1, %c1_i32 : i32
    %23 = arith.extui %22 : i1 to i32
    %c0_i32_17 = arith.constant 0 : i32
    %24 = arith.cmpi ne, %23, %c0_i32_17 : i32
    scf.if %24 {
      %c0_18 = arith.constant 0 : index
      %c0_19 = arith.constant 0 : index
      %25 = vector.load %arg7[%c0_18, %c0_19] : memref<1x8xf32, #tpu.memory_space<vmem>>, vector<1x8xf32>
      %cst_20 = arith.constant 6.250000e-02 : f32
      %26 = vector.broadcast %cst_20 : f32 to vector<1x8xf32>
      %27 = arith.mulf %25, %26 : vector<1x8xf32>
      %28 = vector.shape_cast %27 : vector<1x8xf32> to vector<1x1x8xf32>
      %c0_21 = arith.constant 0 : index
      %c0_22 = arith.constant 0 : index
      %c0_23 = arith.constant 0 : index
      %29 = vector.load %arg6[%c0_21, %c0_22, %c0_23] : memref<1x1x8xf32, #tpu.memory_space<vmem>>, vector<1x1x8xf32>
      tpu.vector_store %arg6[%c0_21, %c0_22, %c0_23], %28 {strides = array<i32>} : memref<1x1x8xf32, #tpu.memory_space<vmem>>, vector<1x1x8xf32>,
    } else {
    }
    return
  }
  func.func @transform_0(%arg0: i32, %arg1: i32) -> (i32, i32, i32) {
    %c0_i32 = arith.constant 0 : i32
    %c0_i32_0 = arith.constant 0 : i32
    return %arg0, %arg1, %c0_i32 : i32, i32, i32
  }
  func.func @transform_1(%arg0: i32, %arg1: i32) -> (i32, i32, i32) {
    %c0_i32 = arith.constant 0 : i32
    %c0_i32_0 = arith.constant 0 : i32
    %c0_i32_1 = arith.constant 0 : i32
    return %c0_i32, %arg1, %c0_i32_0 : i32, i32, i32
  }
  func.func @transform_2(%arg0: i32, %arg1: i32) -> (i32, i32) {
    %c0_i32 = arith.constant 0 : i32
    %c0_i32_0 = arith.constant 0 : i32
    %c0_i32_1 = arith.constant 0 : i32
    return %c0_i32, %c0_i32_0 : i32, i32
  }
  func.func @transform_3(%arg0: i32, %arg1: i32) -> (i32, i32) {
    %c0_i32 = arith.constant 0 : i32
    %c0_i32_0 = arith.constant 0 : i32
    %c0_i32_1 = arith.constant 0 : i32
    return %c0_i32, %c0_i32_0 : i32, i32
  }
  func.func @transform_4(%arg0: i32, %arg1: i32) -> (i32, i32, i32) {
    %c0_i32 = arith.constant 0 : i32
    %c0_i32_0 = arith.constant 0 : i32
    %c0_i32_1 = arith.constant 0 : i32
    return %arg0, %c0_i32, %c0_i32_0 : i32, i32, i32
  }
}

</mosaic_0001>

<bundles_post_ra>
// kernel: tpu_custom_call.1
= control target key start
LH: loop header
LB: loop body
LE: loop exit
PB: predicated region body
PF: predicated region fallthrough
CT: control target
= control target key end

     0   :  { %9 = vsyncpa [#allocation4], 0  ;;  %s859_s0 = inlined_call_operand.vmem [shape: f32[2,16,48], index: 0, kind: input, shape index: {}]   ;;  %s860_s1 = inlined_call_operand.vmem [shape: f32[1,16,48], index: 1, kind: input, shape index: {}]   ;;  %s861_s2 = inlined_call_operand.vmem [shape: f32[48,8], index: 2, kind: input, shape index: {}]   ;;  %s862_s3 = inlined_call_operand.vmem [shape: f32[1,8], index: 3, kind: input, shape index: {}]   ;;  %s863_s4 = inlined_call_operand.hbm [shape: f32[2,1,8], index: 4, kind: output, shape index: {}]  }
   0x1   :  { %11 = vsyncpa [#allocation4 + $0x1], 0  ;;  %s697_s15 = smov 0   ;;  %s699_s16 = smov 0  }
   0x2   :  { %s701_s17 = smov 0   ;;  %s703_s18 = smov 0  }
   0x3   :  { %s705_s19 = smov 0   ;;  %s707_s20 = smov 0  }
   0x4   :  { %s709_s21 = smov 0   ;;  %s711_s22 = smov 0  }
   0x5 LB: > { %s449_s23 = sadd.s32 4294967295, %s665_s22   ;;  %s450_s24 = sadd.s32 4294967294, %s665_s22   ;;  %s665_s22 = sphi %s711_s22, %s17_s22   ;;  %s661_s21 = sphi %s709_s21, %s875_s21   ;;  %s657_s20 = sphi %s707_s20, %s874_s20   ;;  %s653_s19 = sphi %s705_s19, %s873_s19   ;;  %s649_s18 = sphi %s703_s18, %s872_s18   ;;  %s645_s17 = sphi %s701_s17, %s871_s17   ;;  %s641_s16 = sphi %s699_s16, %s870_s16   ;;  %s637_s15 = sphi %s697_s15, %s869_s15  }
   0x6   : > { %s26_s25 = sadd.s32 1, %s657_s20  ;;  %s29_s26 = sadd.s32 1, %s661_s21 }
   0x7   : > { %p27_p0 = scmp.ge.s32.totalorder %s26_s25, 2  ;;  %p142_p1 = scmp.ne.s32.totalorder %s645_s17, %s641_s16 }
   0x8   : > { %p143_p2 = scmp.eq.s32.totalorder %s449_s23, 3  ;;  %p148_p4 = scmp.ne.s32.totalorder %s641_s16, %s637_s15 }
   0x9   : > { %s877_s25 = smov (%p27_p0, %s26_s25), 0  ;;  %s879_s26 = smov (!%p27_p0, %s29_s26), %s661_s21 }
   0xa   : > { %p746_p3 = por %p143_p2, %p142_p1  ;;  %p31_p5 = scmp.ge.s32.totalorder %s879_s26, 2 }
   0xb   : > { %p149_p6 = scmp.eq.s32.totalorder %s450_s24, 3  ;;  %p453_p7 = scmp.ge.s32.totalorder %s665_s22, 1 }
   0xc   : > { %p191_p8 = scmp.lt.s32.totalorder %s665_s22, 5  ;;  %s881_s26 = smov (%p31_p5, %s879_s26), 0 }
   0xd   : > { %866 = sst [smem:[#allocation6_spill]] %s881_s26  ;;  %p756_p9 = por %p149_p6, %p148_p4 }
   0xe   : > { %p192_p10 = pnand %p453_p7, %p191_p8  ;;  %s129_s29 = ssub.s32 %s661_s21, %s881_s26 }
   0xf   : > { %s132_s30 = sadd.s32 1, %s645_s17  ;;  %p130_p11 = scmp.eq.s32.totalorder %s129_s29, 0 }
  0x10   : > { %195 = sbr.rel (%p192_p10) target bundleno = 312 (0x138), region = 36  ;;  %s221_s6 = sand.u32 (!%p192_p10), 1, %s641_s16  }
  0x11   : > { %s764_s5 = scalar_select %p130_p11, %s645_s17, %s132_s30  }
  0x12   : > { %p223_p12 = scmp.lt.s32.totalorder (!%p192_p10), %s653_s19, 1  ;;  %p225_p13 = scmp.lt.s32.totalorder (!%p192_p10), %s649_s18, 1 }
  0x13   : > { %s779_s26 = scalar_lea.vmem (!%p192_p10), [#allocation3], %s221_s6  ;;  %p457_p0 = scmp.ne.s32.totalorder (!%p192_p10), %s649_s18, 0 }
  0x17   : > { %s224_s7 = scalar_select %p223_p12, %s653_s19, 1 }
  0x18   : > { %s226_s8 = scalar_select %p225_p13, %s649_s18, 1 }
  0x19   : > { %s454_s9 = sshll.u32 %s224_s7, 1  ;;  %238 = sbr.rel (%p457_p0) target bundleno = 32 (0x20), region = 40  ;;  %vm239_vm0 = vcmask (!%p457_p0), 57344   ;;  %v667_v0 = vmov (!%p457_p0), 0.0  }
  0x1a   : > { %s228_s10 = sadd.s32 %s454_s9, %s226_s8  ;;  %s456_s11 = sshll.u32 %s226_s8, 3  ;;  %240 = vst.msk [vmem:[#allocation2] sm:$0x1] (!%p457_p0), %vm239_vm0, %v667_v0 }
  0x1b   : > { %s455_s12 = sshll.u32 %s228_s10, 3  ;;  %s234_s23 = scalar_lea.vmem %s860_s1, %s456_s11 }
  0x1c   : > { %s230_s30 = scalar_lea.vmem %s859_s0, %s455_s12 }
  0x20 PF: > { %v244_v1 = vld [vmem:[%s861_s2] sm:$0xff]  ;;  %v245_v2 = vld [vmem:[%s861_s2 + $0x8] sm:$0xff]  ;;  %v246_v3 = vld [vmem:[%s861_s2 + $0x10] sm:$0xff]  ;;  %v668_v4 = vmov 0.0|0.0   ;;  %vm669_vm1 = vmmov 0   ;;  %v670_v7 = vmov 0.0  }
  0x21   : > { %487 = vmatprep.subr.bf16.mxu0 %v668_v4  ;;  %v488_v5 = vpack.c.bf16 %v245_v2, %v244_v1  ;;  %v247_v6 = vld [vmem:[%s861_s2 + $0x18] sm:$0xff]  ;;  %484 = vmatprep.mubr.msk.f32.mxu0 %vm669_vm1, %v670_v7  ;;  %v248_v9 = vld [vmem:[%s861_s2 + $0x20] sm:$0xff]  ;;  %v249_v10 = vld [vmem:[%s861_s2 + $0x28] sm:$0xff]  ;;  %vm257_vm2 = vcmask 392192   ;;  %vm334_vm3 = vcmask 64512   ;;  %vm343_vm4 = vcmask 57344  }
  0x22   : > { %v491_v8 = vpack.c.bf16 %v247_v6, %v246_v3  ;;  %v494_v11 = vpack.c.bf16 %v249_v10, %v248_v9  ;;  %v241_v12 = vld [vmem:[%s230_s30] sm:$0xff]  ;;  %p461_p1 = scmp.ne.s32.totalorder %s649_s18, 1 }
  0x23   : > { %489 = vmatpush3.bf16.msra.mxu0 %v488_v5  ;;  %v242_v13 = vld [vmem:[%s234_s23] sm:$0xff] }
  0x24   : > { %490 = vmatprep.subr.bf16.mxu0 %v668_v4  ;;  %v243_v14 = vadd.f32 %v242_v13, %v241_v12  ;;  %v458_v15 = vld [vmem:[%s862_s3] ss:$0 sm:$0xff] }
  0x25   : > { %v333_v26 = vld [vmem:[#allocation2] sm:$0x1] }
  0x27   : > { %492 = vmatpush3.bf16.msra.mxu0 %v491_v8 }
  0x28   : > { %493 = vmatprep.subr.bf16.mxu0 %v668_v4 }
  0x2b   : > { %495 = vmatpush3.bf16.msra.mxu0 %v494_v11 }
  0x2e   : > { %485 = vmatmul.mubr.msk.f32.vlgmr.msra.gmra.mrb[0].mxu0 %vm257_vm2, %v243_v14 }
 0x101   : > { %v327_v16 = vpop.f32.mrb[0].mxu0 }
 0x102   : > { %v328_v17 = vadd.f32 %v458_v15, %v327_v16  ;;  %v486_v18 = vpop.f32.mrb[1].mxu0 }
 0x104   : > { %v460_v19 = vclamps-f32 %v328_v17, 1.0 }
 0x106   : > { %v335_v20 = vsel %vm334_vm3, %v460_v19, 0.0 }
 0x107   : > { %v336_v21 = vrot.slane %v335_v20, 4 }
 0x109   : > { %v337_v22 = vadd.f32 %v336_v21, %v335_v20 }
 0x10b   : > { %v338_v23 = vrot.slane %v337_v22, 2 }
 0x10d   : > { %v339_v24 = vadd.f32 %v338_v23, %v337_v22 }
 0x10f   : > { %v340_v25 = vrot.slane %v339_v24, 1  ;;  %348 = sbr.rel (%p461_p1) target bundleno = 288 (0x120), region = 44 }
 0x111   : > { %v341_v27 = vadd.f32 %v340_v25, %v339_v24 }
 0x113   : > { %v342_v28 = vadd.f32 %v341_v27, %v333_v26 }
 0x115   : > { %344 = vst.msk [vmem:[#allocation2] sm:$0x1] %vm343_vm4, %v342_v28 }
 0x11c   : > { %v349_v29 = vld [vmem:[#allocation2] sm:$0x1] }
 0x11d   : > { %v350_v30 = vmul.f32 0.0625, %v349_v29 }
 0x11f   : > { %351 = vst.msk [vmem:[%s779_s26] sm:$0x1] %vm343_vm4, %v350_v30 }
 0x120 PF: > { %s462_s23 = sshll.u32 %s653_s19, 4  ;;  %s365_s13 = sshll.u32 %s779_s26, 4  ;;  %s366_s13 = int_to_ptr.vmem [resolvable:$true] %s365_s13 }
 0x121   : > { %s809_s12 = scalar_lea.hbm %s863_s4, %s462_s23  ;;  %s353_s18 = scalar_lea.sflag [#allocation4], %s221_s6 }
 0x122   : > { %s571_s14 = scalar_lea.vmem %s366_s13, 16  ;;  %s671_s24 = smov [#allocation3]  }
 0x123   : > { %p572_p2 = scmp.ne.s32.totalorder %s366_s13, %s571_s14  ;;  %s575_s29 = sshll.u32 %s671_s24, 4  ;;  %s576_s29 = int_to_ptr.vmem [resolvable:$false] %s575_s29 }
 0x124   : > { %s577_s7 = scalar_lea.vmem %s576_s29, 32  ;;  %p578_p6 = scmp.lt.s32.totalorder %s366_s13, %s576_s29 }
 0x125   : > { %p573_p4 = pnand %p572_p2, %p746_p3  ;;  %p579_p7 = scmp.lt.s32.totalorder %s577_s7, %s571_s14 }
 0x127   : > { %p574_p5 = pneg %p573_p4  ;;  %p580_p8 = por %p579_p7, %p578_p6 }
 0x129   : > { %p581_p10 = pnand %p580_p8, %p574_p5 }
 0x12b   : > { %584 = shalt.err (!%p581_p10)
}
 0x12c   : > { %s585_s19 = scalar_lea.hbm %s809_s12, 16  ;;  %s589_s8 = scalar_lea.hbm %s863_s4, 32 }
 0x12d   : > { %p586_p11 = scmp.ne.s32.totalorder %s809_s12, %s585_s19  ;;  %p590_p0 = scmp.lt.u32.totalorder %s809_s12, %s863_s4 }
 0x12e   : > { %p591_p1 = scmp.lt.u32.totalorder %s589_s8, %s585_s19  ;;  %p593_p4 = scmp.lt.u32.totalorder %s585_s19, %s809_s12 }
 0x12f   : > { %p587_p12 = pnand %p586_p11, %p746_p3 }
 0x130   : > { %p592_p2 = por %p591_p1, %p590_p0 }
 0x131   : > { %p588_p13 = pneg %p587_p12 }
 0x132   : > { %p594_p5 = por %p593_p4, %p592_p2 }
 0x134   : > { %p595_p6 = pnand %p594_p5, %p588_p13 }
 0x136   : > { %598 = shalt.err (!%p595_p6)
}
 0x137   : > { %496 = dma.vmem_to_hbm [thread:$0]  (%p746_p3), %s366_s13, 16, %s809_s12, %s353_s18  }
 0x138 PF: > { %p502_p7 = scmp.ge.s32.totalorder %s665_s22, 2  ;;  %s377_s23 = sand.u32 1, %s637_s15  }
 0x139   : > { %s378_s30 = scalar_lea.sflag [#allocation4], %s377_s23 }
 0x13a   : > { %p499_p8 = pnand %p502_p7, %p756_p9 }
 0x13c   : > { %632 = dma.done.wait (!%p499_p8), %s378_s30, 16  }
 0x13d   : > { %634 = vsyncadd (!%p499_p8), %s378_s30, 4294967280  ;;  %s17_s22 = sadd.s32 1, %s665_s22   ;;  %s868_s27 = sld [smem:[#allocation6_spill]] }
 0x13e   : > { %p14_p10 = scmp.ge.s32.totalorder %s17_s22, 6   ;;  %s869_s15 = smov %s641_s16 }
 0x13f   : > { %s870_s16 = smov %s645_s17  ;;  %s871_s17 = smov %s764_s5 }
 0x140   : > { %s872_s18 = smov %s657_s20  ;;  %s873_s19 = smov %s661_s21 }
 0x141   : > { %s874_s20 = smov %s877_s25  ;;  %16 = sbr.rel (!%p14_p10) target bundleno = 5 (0x5), region = 82 }
 0x143   : > { %s875_s21 = smov %s868_s27 }
 0x148   :  { %382 = vsyncpa [#allocation4], 1 }
 0x149   :  { %384 = vsyncpa [#allocation4 + $0x1], 1 }

</bundles_post_ra>
